<compile_context>
chip_gen: v5e
topology: v5e:2x2
jax: 0.10.0
libtpu: 0.0.40
codegen_flags: <defaults>
</compile_context>

<pallas_src>
import functools

import jax
import jax.numpy as jnp
from jax.experimental import pallas as pl
from jax.experimental.pallas import tpu as pltpu

_NUM_SPLITS = 2          # leading "parallel" grid axis (uses both TCs on v7x)
_DEFAULT_TILE_N = 131072  # rows per grid step (lane axis); multiple of 128


def _round_up(x, m):
    return ((x + m - 1) // m) * m


def _criterion_kernel(preds_ref, labels_ref, out_ref, *,
                      gamma, alpha0, alpha_rest, true_n):
    """Grid = (num_splits, tiles_per_split); out block is the accumulator."""
    split = pl.program_id(0)
    step = pl.program_id(1)

    @pl.when(step == 0)
    def _():
        out_ref[...] = jnp.zeros_like(out_ref)

    x = preds_ref[...].astype(jnp.float32)   # [C, T]  logits (classes on sublanes)
    y = labels_ref[...]                      # [1, T]  int32 labels
    c, tile_n = x.shape

    # Numerically stable log-softmax denominator over the class (sublane) axis.
    m = jnp.max(x, axis=0, keepdims=True)                       # [1, T]
    sum_exp = jnp.sum(jnp.exp(x - m), axis=0, keepdims=True)    # [1, T]  (EUP)
    log_denom = m + jnp.log(sum_exp)                            # [1, T]

    # Gather the target-class logit with a static select chain (C is tiny).
    logit_y = x[c - 1:c, :]
    for k in range(c - 2, -1, -1):
        logit_y = jnp.where(y == k, x[k:k + 1, :], logit_y)

    logp = logit_y - log_denom                                  # [1, T] log p_y
    p = jnp.exp(logp)                                           # [1, T] (EUP)

    # alpha[0] = alpha0, alpha[1:] = alpha_rest (baked-in constants).
    alpha_y = jnp.where(y == 0, jnp.float32(alpha0), jnp.float32(alpha_rest))

    one_minus_p = 1.0 - p
    if gamma == 2:
        focal_factor = one_minus_p * one_minus_p
    else:
        focal_factor = one_minus_p ** jnp.float32(gamma)

    # focal + CE per row: (-logp) * (alpha * (1-p)^gamma + 1)
    per_col = (-logp) * (alpha_y * focal_factor + 1.0)          # [1, T]

    # Mask padded rows so they contribute exactly 0 to the sum.
    col = (split * pl.num_programs(1) + step) * tile_n + \
        jax.lax.broadcasted_iota(jnp.int32, (1, tile_n), 1)
    per_col = jnp.where(col < true_n, per_col, 0.0)

    # Accumulate (scalar broadcast into the resident (8,128) output block).
    out_ref[...] = out_ref[...] + jnp.sum(per_col)


def criterion_loss(preds, labels, *, num_classes=3, focal_alpha=0.25, gamma=2,
                   tile_n=_DEFAULT_TILE_N, num_splits=_NUM_SPLITS):
    """Equivalent of Criterion.forward(outputs, targets) (loss value only)."""
    preds2d = preds.reshape(-1, preds.shape[-1])           # [N, C]
    n, c = preds2d.shape
    assert c == num_classes

    # Lane-dense layout: classes on sublanes, rows on lanes.
    preds_t = preds2d.T                                     # [C, N]
    labels_row = labels.reshape(1, -1).astype(jnp.int32)    # [1, N]

    # Tile sizing / padding (tile must be a multiple of 128 lanes).
    tile_n = min(tile_n, _round_up(max(n, 1), 128))
    n_pad = _round_up(n, num_splits * tile_n)
    if n_pad != n:
        preds_t = jnp.pad(preds_t, ((0, 0), (0, n_pad - n)))
        labels_row = jnp.pad(labels_row, ((0, 0), (0, n_pad - n)))
    tiles_per_split = n_pad // (num_splits * tile_n)

    # alpha vector from focal_loss.__init__ with scalar alpha.
    alpha0 = float(focal_alpha)
    alpha_rest = 1.0 - float(focal_alpha)

    kernel = functools.partial(
        _criterion_kernel, gamma=gamma, alpha0=alpha0, alpha_rest=alpha_rest,
        true_n=n)

    # VMEM budget: double-buffered preds + labels blocks + output block.
    itemsize = jnp.dtype(preds_t.dtype).itemsize
    vmem_bytes = 2 * (num_classes * tile_n * itemsize + tile_n * 4) + 2 * 8 * 128 * 4
    vmem_limit = int(min(max(2 * vmem_bytes, 4 * 1024 * 1024), 48 * 1024 * 1024))

    cost = pl.CostEstimate(
        flops=10 * n * num_classes,
        transcendentals=n * (num_classes + 1),
        bytes_accessed=n * num_classes * itemsize + n * 4 + num_splits * 8 * 128 * 4,
    )

    out = pl.pallas_call(
        kernel,
        out_shape=jax.ShapeDtypeStruct((num_splits * 8, 128), jnp.float32),
        grid=(num_splits, tiles_per_split),
        in_specs=[
            pl.BlockSpec((num_classes, tile_n),
                         lambda s, i: (0, s * tiles_per_split + i)),
            pl.BlockSpec((1, tile_n),
                         lambda s, i: (0, s * tiles_per_split + i)),
        ],
        out_specs=pl.BlockSpec((8, 128), lambda s, i: (s, 0)),
        compiler_params=pltpu.CompilerParams(
            dimension_semantics=("parallel", "arbitrary"),
            vmem_limit_bytes=vmem_limit),
        cost_estimate=cost,
    )(preds_t, labels_row)

    # Each split's (8,128) block holds its partial sum broadcast everywhere.
    partials = out[::8, 0]                                  # (num_splits,)
    return jnp.sum(partials) / jnp.float32(n)


def _reference_loss(preds, labels, *, num_classes=3, focal_alpha=0.25, gamma=2):
    """Pure-JAX reference for a sanity check."""
    x = preds.reshape(-1, preds.shape[-1]).astype(jnp.float32)
    y = labels.reshape(-1).astype(jnp.int32)
    logp_all = jax.nn.log_softmax(x, axis=-1)
    p_all = jnp.exp(logp_all)
    logp = jnp.take_along_axis(logp_all, y[:, None], axis=1)[:, 0]
    p = jnp.take_along_axis(p_all, y[:, None], axis=1)[:, 0]
    alpha_vec = jnp.full((num_classes,), 1.0 - focal_alpha, dtype=jnp.float32)
    alpha_vec = alpha_vec.at[0].set(focal_alpha)
    a = alpha_vec[y]
    focal = jnp.mean(a * (1.0 - p) ** gamma * (-logp))
    ce = jnp.mean(-logp)
    return focal + ce


if __name__ == "__main__":
    key = jax.random.PRNGKey(0)
    k1, k2 = jax.random.split(key)

    num_classes = 3
    batch, boxes = 2, 4   # outputs: [B, N, C], targets: [B, N]

    preds = jax.random.normal(k1, (batch, boxes, num_classes), dtype=jnp.float32)
    labels = jax.random.randint(k2, (batch, boxes), 0, num_classes, dtype=jnp.int32)

    loss = criterion_loss(preds, labels, num_classes=num_classes)
    loss = jax.block_until_ready(loss)

    ref = jax.block_until_ready(_reference_loss(preds, labels, num_classes=num_classes))
    assert jnp.allclose(loss, ref, atol=1e-5, rtol=1e-5), (loss, ref)

    # TODO(synk): the PyTorch forward's `print(targets)` / accuracy logging /
    # pdb side effects have no kernel equivalent and are intentionally omitted.
    print("KERNEL_OK")
</pallas_src>

<mosaic_0001>
module attributes {stable_mosaic.version = 11 : i64} {
  func.func @_criterion_kernel(%arg0: i32, %arg1: i32, %arg2: memref<3x128xf32, #tpu.memory_space<vmem>>, %arg3: memref<1x128xi32, #tpu.memory_space<vmem>>, %arg4: memref<8x128xf32, #tpu.memory_space<vmem>>) attributes {dimension_semantics = [#tpu.dimension_semantics<parallel>, #tpu.dimension_semantics<arbitrary>], iteration_bounds = array<i64: 2, 1>, scalar_prefetch = 0 : i64, scratch_operands = 0 : i64, tpu.core_type = #tpu.core_type<tc>, window_params = [{transform_indices = @transform_0, window_bounds = array<i64: 3, 128>}, {transform_indices = @transform_1, window_bounds = array<i64: 1, 128>}, {transform_indices = @transform_2, window_bounds = array<i64: 8, 128>}]} {
    %c0_i32 = arith.constant 0 : i32
    %0 = arith.cmpi eq, %arg1, %c0_i32 : i32
    %1 = arith.extui %0 : i1 to i32
    %c0_i32_0 = arith.constant 0 : i32
    %2 = arith.cmpi ne, %1, %c0_i32_0 : i32
    scf.if %2 {
      %cst_19 = arith.constant 0.000000e+00 : f32
      %57 = vector.broadcast %cst_19 : f32 to vector<8x128xf32>
      %c0_20 = arith.constant 0 : index
      %c0_21 = arith.constant 0 : index
      %58 = vector.load %arg4[%c0_20, %c0_21] : memref<8x128xf32, #tpu.memory_space<vmem>>, vector<8x128xf32>
      tpu.vector_store %arg4[%c0_20, %c0_21], %57 {strides = array<i32>} : memref<8x128xf32, #tpu.memory_space<vmem>>, vector<8x128xf32>,
    } else {
    }
    %c0 = arith.constant 0 : index
    %c0_1 = arith.constant 0 : index
    %3 = vector.load %arg2[%c0, %c0_1] : memref<3x128xf32, #tpu.memory_space<vmem>>, vector<3x128xf32>
    %c0_2 = arith.constant 0 : index
    %c0_3 = arith.constant 0 : index
    %4 = vector.load %arg3[%c0_2, %c0_3] : memref<1x128xi32, #tpu.memory_space<vmem>>, vector<1x128xi32>
    %cst = arith.constant dense<0xFF800000> : vector<128xf32>
    %5 = vector.multi_reduction <maximumf>, %3, %cst [0] : vector<3x128xf32> to vector<128xf32>
    %6 = vector.shape_cast %5 : vector<128xf32> to vector<1x128xf32>
    %7 = vector.broadcast %6 : vector<1x128xf32> to vector<3x128xf32>
    %8 = arith.subf %3, %7 : vector<3x128xf32>
    %9 = math.exp %8 : vector<3x128xf32>
    %cst_4 = arith.constant dense<0.000000e+00> : vector<128xf32>
    %10 = vector.multi_reduction <add>, %9, %cst_4 [0] : vector<3x128xf32> to vector<128xf32>
    %11 = vector.shape_cast %10 : vector<128xf32> to vector<1x128xf32>
    %12 = math.log %11 : vector<1x128xf32>
    %13 = arith.addf %6, %12 : vector<1x128xf32>
    %14 = vector.extract_strided_slice %3 {offsets = [2, 0], sizes = [1, 128], strides = [1, 1]} : vector<3x128xf32> to vector<1x128xf32>
    %c1_i32 = arith.constant 1 : i32
    %15 = vector.broadcast %c1_i32 : i32 to vector<1x128xi32>
    %16 = arith.cmpi eq, %4, %15 : vector<1x128xi32>
    %17 = vector.extract_strided_slice %3 {offsets = [1, 0], sizes = [1, 128], strides = [1, 1]} : vector<3x128xf32> to vector<1x128xf32>
    %18 = arith.select %16, %17, %14 : vector<1x128xi1>, vector<1x128xf32>
    %c0_i32_5 = arith.constant 0 : i32
    %19 = vector.broadcast %c0_i32_5 : i32 to vector<1x128xi32>
    %20 = arith.cmpi eq, %4, %19 : vector<1x128xi32>
    %21 = vector.extract_strided_slice %3 {offsets = [0, 0], sizes = [1, 128], strides = [1, 1]} : vector<3x128xf32> to vector<1x128xf32>
    %22 = arith.select %20, %21, %18 : vector<1x128xi1>, vector<1x128xf32>
    %23 = arith.subf %22, %13 : vector<1x128xf32>
    %24 = math.exp %23 : vector<1x128xf32>
    %c0_i32_6 = arith.constant 0 : i32
    %25 = vector.broadcast %c0_i32_6 : i32 to vector<1x128xi32>
    %26 = arith.cmpi eq, %4, %25 : vector<1x128xi32>
    %cst_7 = arith.constant 2.500000e-01 : f32
    %cst_8 = arith.constant 7.500000e-01 : f32
    %27 = vector.broadcast %cst_7 : f32 to vector<1x128xf32>
    %28 = vector.broadcast %cst_8 : f32 to vector<1x128xf32>
    %29 = arith.select %26, %27, %28 : vector<1x128xi1>, vector<1x128xf32>
    %cst_9 = arith.constant 1.000000e+00 : f32
    %30 = vector.broadcast %cst_9 : f32 to vector<1x128xf32>
    %31 = arith.subf %30, %24 : vector<1x128xf32>
    %32 = arith.mulf %31, %31 : vector<1x128xf32>
    %cst_10 = arith.constant 0.000000e+00 : f32
    %33 = vector.broadcast %cst_10 : f32 to vector<1x128xf32>
    %34 = arith.subf %33, %23 : vector<1x128xf32>
    %35 = arith.mulf %29, %32 : vector<1x128xf32>
    %cst_11 = arith.constant 1.000000e+00 : f32
    %36 = vector.broadcast %cst_11 : f32 to vector<1x128xf32>
    %37 = arith.addf %35, %36 : vector<1x128xf32>
    %38 = arith.mulf %34, %37 : vector<1x128xf32>
    %c1_i32_12 = arith.constant 1 : i32
    %39 = arith.muli %arg0, %c1_i32_12 : i32
    %40 = arith.addi %39, %arg1 : i32
    %c128_i32 = arith.constant 128 : i32
    %41 = arith.muli %40, %c128_i32 : i32
    %42 = tpu.iota {dimensions = array<i32: 1>} : vector<1x128xi32>
    %43 = vector.broadcast %41 : i32 to vector<1x128xi32>
    %44 = arith.addi %43, %42 : vector<1x128xi32>
    %c8_i32 = arith.constant 8 : i32
    %45 = vector.broadcast %c8_i32 : i32 to vector<1x128xi32>
    %46 = arith.cmpi slt, %44, %45 : vector<1x128xi32>
    %cst_13 = arith.constant 0.000000e+00 : f32
    %47 = vector.broadcast %cst_13 : f32 to vector<1x128xf32>
    %48 = arith.select %46, %38, %47 : vector<1x128xi1>, vector<1x128xf32>
    %c0_14 = arith.constant 0 : index
    %c0_15 = arith.constant 0 : index
    %49 = vector.load %arg4[%c0_14, %c0_15] : memref<8x128xf32, #tpu.memory_space<vmem>>, vector<8x128xf32>
    %50 = vector.shape_cast %48 : vector<1x128xf32> to vector<1x1x128xf32>
    %cst_16 = arith.constant dense<0.000000e+00> : vector<1xf32>
    %51 = vector.multi_reduction <add>, %50, %cst_16 [1, 2] : vector<1x1x128xf32> to vector<1xf32>
    %52 = vector.shape_cast %51 : vector<1xf32> to vector<1x1x1xf32>
    %53 = vector.extract %52[0, 0, 0] : f32 from vector<1x1x1xf32>
    %54 = vector.broadcast %53 : f32 to vector<8x128xf32>
    %55 = arith.addf %49, %54 : vector<8x128xf32>
    %c0_17 = arith.constant 0 : index
    %c0_18 = arith.constant 0 : index
    %56 = vector.load %arg4[%c0_17, %c0_18] : memref<8x128xf32, #tpu.memory_space<vmem>>, vector<8x128xf32>
    tpu.vector_store %arg4[%c0_17, %c0_18], %55 {strides = array<i32>} : memref<8x128xf32, #tpu.memory_space<vmem>>, vector<8x128xf32>,
    return
  }
  func.func @transform_0(%arg0: i32, %arg1: i32) -> (i32, i32) {
    %c1_i32 = arith.constant 1 : i32
    %0 = arith.muli %arg0, %c1_i32 : i32
    %1 = arith.addi %0, %arg1 : i32
    %c0_i32 = arith.constant 0 : i32
    %c0_i32_0 = arith.constant 0 : i32
    return %c0_i32, %1 : i32, i32
  }
  func.func @transform_1(%arg0: i32, %arg1: i32) -> (i32, i32) {
    %c1_i32 = arith.constant 1 : i32
    %0 = arith.muli %arg0, %c1_i32 : i32
    %1 = arith.addi %0, %arg1 : i32
    %c0_i32 = arith.constant 0 : i32
    %c0_i32_0 = arith.constant 0 : i32
    return %c0_i32, %1 : i32, i32
  }
  func.func @transform_2(%arg0: i32, %arg1: i32) -> (i32, i32) {
    %c0_i32 = arith.constant 0 : i32
    %c0_i32_0 = arith.constant 0 : i32
    return %arg0, %c0_i32 : i32, i32
  }
}

</mosaic_0001>

<bundles_post_ra>
// kernel: tpu_custom_call.1
= control target key start
LH: loop header
LB: loop body
LE: loop exit
PB: predicated region body
PF: predicated region fallthrough
CT: control target
= control target key end

     0   :  { %7 = vsyncpa [#allocation3], 0  ;;  %s794_s0 = inlined_call_operand.hbm [shape: f32[3,256], index: 0, kind: input, shape index: {}]   ;;  %s795_s1 = inlined_call_operand.hbm [shape: s32[1,256], index: 1, kind: input, shape index: {}]   ;;  %s796_s2 = inlined_call_operand.hbm [shape: f32[16,128], index: 2, kind: output, shape index: {}]  }
   0x1   :  { %9 = vsyncpa [#allocation3 + $0x1], 0 }
   0x2   :  { %10 = vsyncpa [#allocation6], 0 }
   0x3   :  { %12 = vsyncpa [#allocation6 + $0x1], 0 }
   0x4   :  { %13 = vsyncpa [#allocation4], 0 }
   0x5   :  { %15 = vsyncpa [#allocation4 + $0x1], 0  ;;  %s660_s9 = smov 0   ;;  %s662_s10 = smov 0  }
   0x6   :  { %s664_s11 = smov 0   ;;  %s666_s12 = smov 0  }
   0x7   :  { %s668_s13 = smov 0   ;;  %s670_s14 = smov 0  }
   0x8 LB: > { %s405_s15 = sadd.s32 4294967295, %s642_s14   ;;  %s406_s16 = sadd.s32 4294967294, %s642_s14   ;;  %s642_s14 = sphi %s670_s14, %s21_s14   ;;  %s638_s13 = sphi %s668_s13, %s805_s13   ;;  %s634_s12 = sphi %s666_s12, %s804_s12   ;;  %s630_s11 = sphi %s664_s11, %s803_s11   ;;  %s626_s10 = sphi %s662_s10, %s802_s10   ;;  %s622_s9 = sphi %s660_s9, %s801_s9  }
   0x9   : > { %s33_s17 = sadd.s32 1, %s638_s13  ;;  %s42_s18 = sadd.s32 1, %s630_s11 }
   0xa   : > { %p35_p0 = scmp.ge.s32.totalorder %s33_s17, 2  ;;  %p49_p1 = scmp.ne.s32.totalorder %s630_s11, %s626_s10 }
   0xb   : > { %p50_p2 = scmp.eq.s32.totalorder %s642_s14, 0  ;;  %p55_p3 = scmp.ne.s32.totalorder %s626_s10, %s622_s9 }
   0xc   : > { %s807_s17 = smov (%p35_p0, %s33_s17), 0  ;;  %p56_p5 = scmp.eq.s32.totalorder %s405_s15, 0 }
   0xd   : > { %p701_p4 = por %p50_p2, %p49_p1  ;;  %s39_s20 = ssub.s32 %s638_s13, %s807_s17 }
   0xe   : > { %p107_p6 = scmp.eq.s32.totalorder %s405_s15, 1  ;;  %p40_p7 = scmp.eq.s32.totalorder %s39_s20, 0 }
   0xf   : > { %p707_p8 = por %p56_p5, %p55_p3  ;;  %p113_p10 = scmp.eq.s32.totalorder %s406_s16, 1 }
  0x10   : > { %p711_p9 = por %p107_p6, %p49_p1  ;;  %p408_p12 = scmp.ge.s32.totalorder %s642_s14, 2 }
  0x11   : > { %s716_s23 = scalar_select %p40_p7, %s630_s11, %s42_s18  }
  0x12   : > { %p718_p11 = por %p113_p10, %p55_p3  ;;  %p438_p13 = scmp.lt.s32.totalorder %s642_s14, 2 }
  0x13   : > { %s133_s25 = sand.u32 1, %s630_s11   ;;  %s410_s27 = sshll.u32 %s638_s13, 2 }
  0x14   : > { %s409_s26 = sshll.u32 %s133_s25, 2  ;;  %s142_s30 = scalar_lea.hbm %s794_s0, %s410_s27 }
  0x15   : > { %s137_s3 = scalar_lea.vmem [#allocation2], %s409_s26  ;;  %s144_s5 = sshll.u32 %s142_s30, 4  ;;  %s145_s5 = int_to_ptr.hbm [resolvable:$true] %s144_s5 }
  0x16   : > { %s146_s4 = sshll.u32 %s137_s3, 4  ;;  %p428_p0 = pnand %p438_p13, %p701_p4  ;;  %s147_s4 = int_to_ptr.vmem [resolvable:$true] %s146_s4 }
  0x17   : > { %p411_p1 = scmp.ge.s32.totalorder %s642_s14, 1  ;;  %p169_p2 = scmp.lt.s32.totalorder %s642_s14, 3 }
  0x18   : > { %s134_s6 = scalar_lea.sflag [#allocation3], %s133_s25  ;;  %s160_s15 = scalar_lea.hbm %s795_s1, %s638_s13 }
  0x19   : > { %430 = dma.hbm_to_vmem [thread:$0]  (!%p428_p0), %s145_s5, 64, %s147_s4, %s134_s6  }
  0x1a   : > { %p170_p3 = pnand %p411_p1, %p169_p2  ;;  %s156_s16 = scalar_lea.vmem [#allocation5], %s133_s25 }
  0x1b   : > { %s164_s18 = sshll.u32 %s156_s16, 4  ;;  %s162_s20 = sshll.u32 %s160_s15, 4  ;;  %s165_s18 = int_to_ptr.vmem [resolvable:$true] %s164_s18  ;;  %s163_s20 = int_to_ptr.hbm [resolvable:$true] %s162_s20 }
  0x1c   : > { %s154_s26 = scalar_lea.sflag [#allocation6], %s133_s25  ;;  %173 = sbr.rel (%p170_p3) target bundleno = 290 (0x122), region = 28 }
  0x1d   : > { %433 = dma.hbm_to_vmem [thread:$0]  (!%p428_p0), %s163_s20, 16, %s165_s18, %s154_s26  }
  0x1e   : > { %s738_s19 = sand.u32 (!%p170_p3), 1, %s626_s10  }
  0x1f   : > { %s412_s27 = sshll.u32 (!%p170_p3), %s738_s19, 2  ;;  %s176_s28 = scalar_lea.sflag (!%p170_p3), [#allocation3], %s738_s19 }
  0x20   : > { %s179_s29 = scalar_lea.vmem (!%p170_p3), [#allocation2], %s412_s27 }
  0x21   : > { %609 = dma.done.wait (%p707_p8), %s176_s28, 64  }
  0x22   : > { %611 = vsyncadd (%p707_p8), %s176_s28, 4294967232  ;;  %s186_s25 = scalar_lea.sflag [#allocation6], %s738_s19  ;;  %s188_s30 = scalar_lea.vmem [#allocation5], %s738_s19 }
  0x23   : > { %613 = dma.done.wait (%p707_p8), %s186_s25, 16  }
  0x24   : > { %615 = vsyncadd (%p707_p8), %s186_s25, 4294967280  ;;  %vm223_vm0 = vcmask 1042432   ;;  %v221_v0 = vld [vmem:[%s179_s29] sm:$0x7]  ;;  %v222_v19 = vld [vmem:[%s188_s30] sm:$0x1]  ;;  %v269_v28 = vlaneseq }
  0x25   : > { %v224_v1 = vsel %vm223_vm0, %v221_v0, -inf  ;;  %246 = vst [vmem:[#allocation1] sm:$0xff] %v221_v0  ;;  %vm244_vm1 = vcmp.eq.s32.totalorder %v222_v19, 1  ;;  %vm255_vm2 = vcmp.eq.s32.totalorder %v222_v19, 0  ;;  %s414_s21 = sshll.u32 %s634_s12, 7  ;;  %v644_v33 = vmov 0.75  }
  0x26   : > { %v225_v2 = vrot.slane %v224_v1, 4  ;;  %v270_v30 = vand.u32 127, %v269_v28  ;;  %v271_v32 = vstv %s414_s21  ;;  %v260_v34 = vsel %vm255_vm2, 0.25, %v644_v33  ;;  %s413_s3 = sshll.u32 %s738_s19, 3  ;;  %s416_s4 = sshll.u32 %s634_s12, 3 }
  0x27   : > { %vm276_vm4 = vcmask 1040384   ;;  %s301_s7 = scalar_lea.hbm %s796_s2, %s416_s4  ;;  %s213_s8 = scalar_lea.vmem [#allocation7], %s413_s3 }
  0x28   : > { %v226_v3 = vmax.f32 %v224_v1, %v225_v2  ;;  %v272_v36 = vadd.s32 %v271_v32, %v270_v30  ;;  %s303_s15 = sshll.u32 %s213_s8, 4  ;;  %s305_s16 = sshll.u32 %s301_s7, 4  ;;  %s304_s15 = int_to_ptr.vmem [resolvable:$true] %s303_s15  ;;  %s306_s16 = int_to_ptr.hbm [resolvable:$true] %s305_s16 }
  0x29   : > { %s291_s20 = scalar_lea.sflag [#allocation4], %s738_s19  ;;  %s570_s26 = sshra.s32 %s306_s16, 4  ;;  %s571_s26 = int_to_ptr.hbm [resolvable:$true] %s570_s26 }
  0x2a   : > { %v227_v4 = vrot.slane %v226_v3, 2  ;;  %vm273_vm3 = vcmp.lt.s32.totalorder %v272_v36, 8  ;;  %s572_s27 = scalar_lea.hbm %s571_s26, 8  ;;  %s576_s29 = scalar_lea.hbm %s796_s2, 16 }
  0x2b   : > { %p573_p4 = scmp.ne.s32.totalorder %s571_s26, %s572_s27  ;;  %p577_p7 = scmp.lt.s32.totalorder %s571_s26, %s796_s2 }
  0x2c   : > { %v228_v5 = vmax.f32 %v226_v3, %v227_v4  ;;  %v248_v6 = vld [vmem:[#allocation1 + $0x1] ss:$9 sm:$0xff]  ;;  %p578_p8 = scmp.lt.s32.totalorder %s576_s29, %s572_s27 }
  0x2d   : > { %250 = vst [vmem:[#allocation1] sm:$0xff] %v221_v0  ;;  %p574_p5 = pnand %p573_p4, %p711_p9 }
  0x2e   : > { %v229_v7 = vrot.slane %v228_v5, 1  ;;  %p579_p10 = por %p578_p8, %p577_p7 }
  0x2f   : > { %p575_p6 = pneg %p574_p5 }
  0x30   : > { %v230_v8 = vmax.f32 %v228_v5, %v229_v7 }
  0x31   : > { %p580_p13 = pnand %p579_p10, %p575_p6 }
  0x32   : > { %v231_v9 = vsub.f32 %v221_v0, %v230_v8 }
  0x34   : > { %v232_v10 = vmul.f32 1.442695, %v231_v9  ;;  %v252_v20 = vld [vmem:[#allocation1 + $0x2] ss:$9 sm:$0xff] }
  0x35   : > { %v254_v21 = vsel %vm244_vm1, %v248_v6, %v252_v20 }
  0x36   : > { %490 = vpow2.f32 %v232_v10  ;;  %v256_v24 = vsel %vm255_vm2, %v221_v0, %v254_v21 }
  0x3c   : > { %v491_v11 = vpop.eup %490 }
  0x3d   : > { %v234_v12 = vsel %vm223_vm0, %v491_v11, 0.0 }
  0x3e   : > { %v235_v13 = vrot.slane %v234_v12, 4 }
  0x40   : > { %v236_v14 = vadd.f32 %v235_v13, %v234_v12 }
  0x42   : > { %v237_v15 = vrot.slane %v236_v14, 2 }
  0x44   : > { %v238_v16 = vadd.f32 %v237_v15, %v236_v14 }
  0x46   : > { %v239_v17 = vrot.slane %v238_v16, 1 }
  0x48   : > { %v240_v18 = vadd.f32 %v239_v17, %v238_v16 }
  0x4a   : > { %492 = vlog2.f32 %v240_v18 }
  0x50   : > { %v493_v22 = vpop.eup %492 }
  0x51   : > { %v242_v23 = vmul.f32 0.6931472, %v493_v22 }
  0x53   : > { %v243_v25 = vadd.f32 %v242_v23, %v230_v8 }
  0x55   : > { %v257_v26 = vsub.f32 %v256_v24, %v243_v25 }
  0x57   : > { %v258_v27 = vmul.f32 1.442695, %v257_v26  ;;  %v263_v37 = vsub.f32 0.0, %v257_v26 }
  0x59   : > { %494 = vpow2.f32 %v258_v27 }
  0x5f   : > { %v495_v29 = vpop.eup %494 }
  0x60   : > { %v261_v31 = vsub.f32 1.0, %v495_v29 }
  0x62   : > { %v262_v35 = vmul.f32 %v261_v31, %v261_v31 }
  0x64   : > { %v264_v38 = vmul.f32 %v262_v35, %v260_v34 }
  0x66   : > { %v265_v39 = vadd.f32 1.0, %v264_v38 }
  0x68   : > { %v266_v40 = vmul.f32 %v265_v39, %v263_v37 }
  0x6a   : > { %v274_v41 = vsel %vm273_vm3, %v266_v40, 0.0 }
  0x6b   : > { %v277_v42 = vsel %vm276_vm4, %v274_v41, 0.0 }
  0x6c   : > { %278 = vadd.xlane.f32.xlu0 %v277_v42 }
  0xdf   : > { %v279_v43 = vpop.xlane.xlu0 %278 }
  0xe0   : > { %v280_v44 = vrot.slane %v279_v43, 4 }
  0xe2   : > { %v281_v45 = vadd.f32 %v280_v44, %v279_v43 }
  0xe4   : > { %v282_v46 = vrot.slane %v281_v45, 2 }
  0xe6   : > { %v283_v47 = vadd.f32 %v282_v46, %v281_v45 }
  0xe8   : > { %v284_v48 = vrot.slane %v283_v47, 1 }
  0xea   : > { %v285_v49 = vadd.f32 %v284_v48, %v283_v47 }
  0xec   : > { %419 = vpush %v285_v49 }
 0x11d   : > { %s420_s18 = spop %419 }
 0x11e   : > { %v287_v50 = vstv %s420_s18 }
 0x11f   : > { %289 = vst [vmem:[%s213_s8] sm:$0xff] %v287_v50 }
 0x120   : > { %583 = shalt.err (!%p580_p13)
}
 0x121   : > { %425 = dma.vmem_to_hbm [thread:$0]  (%p711_p9), %s304_s15, 128, %s306_s16, %s291_s20  }
 0x122 PF: > { %s317_s19 = sand.u32 1, %s622_s9   ;;  %p435_p0 = pnand %p408_p12, %p718_p11 }
 0x123   : > { %s318_s21 = scalar_lea.sflag [#allocation4], %s317_s19 }
 0x124   : > { %p436_p1 = pneg %p435_p0 }
 0x126   : > { %617 = dma.done.wait (%p436_p1), %s318_s21, 128  }
 0x127   : > { %619 = vsyncadd (%p436_p1), %s318_s21, 4294967168  ;;  %s21_s14 = sadd.s32 1, %s642_s14   ;;  %s801_s9 = smov %s626_s10 }
 0x128   : > { %p18_p2 = scmp.ge.s32.totalorder %s21_s14, 4   ;;  %s802_s10 = smov %s630_s11 }
 0x129   : > { %s803_s11 = smov %s716_s23  ;;  %s804_s12 = smov %s638_s13 }
 0x12a   : > { %s805_s13 = smov %s807_s17  ;;  %20 = sbr.rel (!%p18_p2) target bundleno = 8 (0x8), region = 92 }
 0x12f   :  { %324 = vsyncpa [#allocation3], 1 }
 0x130   :  { %326 = vsyncpa [#allocation3 + $0x1], 1 }
 0x131   :  { %327 = vsyncpa [#allocation6], 1 }
 0x132   :  { %329 = vsyncpa [#allocation6 + $0x1], 1 }
 0x133   :  { %330 = vsyncpa [#allocation4], 1 }
 0x134   :  { %332 = vsyncpa [#allocation4 + $0x1], 1 }

</bundles_post_ra>
